<compile_context>
chip_gen: v5e
topology: v5e:2x2
jax: 0.10.0
libtpu: 0.0.40
codegen_flags: <defaults>
</compile_context>

<pallas_src>
import functools
import math

import jax
import jax.numpy as jnp
from jax.experimental import pallas as pl
from jax.experimental.pallas import tpu as pltpu

CLAMP_LB = 1e-40
CLAMP_UB = 1.0

LANES = 128
SUBLANES = 8


def _round_up(x, m):
    return (x + m - 1) // m * m


def _lane_dense_view(x):
    """Flatten to a (n_rows, 128) lane-dense slab, keeping the native dtype.

    When numel is already a multiple of 8*128 this is a pure (copy-free)
    reshape; otherwise the flat tail is zero-padded once (zeros clamp
    identically in both inputs, so they contribute exactly 0 to the loss).
    """
    n = math.prod(x.shape)
    flat = x.reshape(-1)
    padded = _round_up(max(n, 1), SUBLANES * LANES)
    if padded != n:
        flat = jnp.pad(flat, (0, padded - n))
    return flat.reshape(padded // LANES, LANES)


def _gloss2_kernel(real_ref, gen_ref, out_ref, acc_ref, *,
                   row_tile, steps, n_rows, needs_mask):
    c = pl.program_id(0)          # partition (parallel across TensorCores)
    i = pl.program_id(1)          # reduction step within the partition

    @pl.when(i == 0)
    def _init():
        acc_ref[...] = jnp.zeros_like(acc_ref)

    # Cast after the load (inputs stay in their native dtype in HBM).
    r = jnp.clip(real_ref[...].astype(jnp.float32), CLAMP_LB, CLAMP_UB)
    g = jnp.clip(gen_ref[...].astype(jnp.float32), CLAMP_LB, CLAMP_UB)
    diff = r - g
    sq = diff * diff

    if needs_mask:
        # Zero rows past the real extent (partial last tile and/or phantom
        # tiles created by the cross-core split).  Mask the squared error,
        # not the inputs, so the sum stays exact.
        t = c * steps + i                                  # logical tile id
        row_id = t * row_tile + jax.lax.broadcasted_iota(
            jnp.int32, (row_tile, LANES), 0)
        sq = jnp.where(row_id < n_rows, sq, 0.0)

    acc_ref[...] += sq                                     # pure VPU, no XLU

    @pl.when(i == steps - 1)
    def _finalize():
        # Fold the (row_tile, 128) accumulator into one (8, 128) tile; the
        # cross-lane finish happens once in XLA on a tiny array.
        partial = acc_ref[0:SUBLANES, :]
        for k in range(1, row_tile // SUBLANES):
            partial = partial + acc_ref[k * SUBLANES:(k + 1) * SUBLANES, :]
        out_ref[...] = partial


def gloss2(d_logits_real, d_logits_gen, *, row_tile=1024, num_partitions=2):
    assert d_logits_real.shape == d_logits_gen.shape

    r2 = _lane_dense_view(d_logits_real)
    g2 = _lane_dense_view(d_logits_gen)
    n_rows = r2.shape[0]                       # multiple of 8 by construction

    row_tile = min(_round_up(row_tile, SUBLANES), n_rows)
    grid_rows = pl.cdiv(n_rows, row_tile)
    num_partitions = max(1, min(num_partitions, grid_rows))
    steps = pl.cdiv(grid_rows, num_partitions)
    has_phantom = (num_partitions * steps != grid_rows)
    needs_mask = (n_rows % row_tile != 0) or has_phantom

    if has_phantom:
        # Phantom tiles (from the cross-core split) re-read the last real tile;
        # their contribution is masked to zero inside the kernel.
        def in_map(c, i):
            return (jnp.minimum(c * steps + i, grid_rows - 1), 0)
    else:
        def in_map(c, i):
            return (c * steps + i, 0)

    kernel = functools.partial(
        _gloss2_kernel, row_tile=row_tile, steps=steps,
        n_rows=n_rows, needs_mask=needs_mask)

    itemsize = jnp.dtype(r2.dtype).itemsize
    cost = pl.CostEstimate(
        flops=7 * r2.size,
        transcendentals=0,
        bytes_accessed=2 * r2.size * itemsize
        + num_partitions * SUBLANES * LANES * 4)

    partials = pl.pallas_call(
        kernel,
        out_shape=jax.ShapeDtypeStruct(
            (num_partitions * SUBLANES, LANES), jnp.float32),
        grid_spec=pltpu.PrefetchScalarGridSpec(
            num_scalar_prefetch=0,
            grid=(num_partitions, steps),
            in_specs=[
                pl.BlockSpec((row_tile, LANES), in_map),
                pl.BlockSpec((row_tile, LANES), in_map),
            ],
            out_specs=pl.BlockSpec((SUBLANES, LANES), lambda c, i: (c, 0)),
            scratch_shapes=[pltpu.VMEM((row_tile, LANES), jnp.float32)],
        ),
        compiler_params=pltpu.CompilerParams(
            dimension_semantics=("parallel", "arbitrary"),
            vmem_limit_bytes=32 * 1024 * 1024,
        ),
        cost_estimate=cost,
    )(r2, g2)

    # mse1 + mse2 == 2 * sum(sq_err); the unused mean-over-time branch of the
    # reference is dead code for the returned value and is omitted.
    return 2.0 * jnp.sum(partials)


def _gloss2_ref(r, g):
    rc = jnp.clip(r.astype(jnp.float32), CLAMP_LB, CLAMP_UB)
    gc = jnp.clip(g.astype(jnp.float32), CLAMP_LB, CLAMP_UB)
    sq = (rc - gc) ** 2
    return 2.0 * jnp.sum(sq)


if __name__ == "__main__":
    key = jax.random.PRNGKey(0)
    k1, k2, k3, k4 = jax.random.split(key, 4)

    # Small shape consistent with the module's 3-D [batch, time, feature] inputs,
    # with some out-of-range values to exercise the clamp path.
    B, S, F = 2, 8, 32
    d_logits_real = jax.random.uniform(k1, (B, S, F), jnp.float32, -0.2, 1.2)
    d_logits_gen = jax.random.uniform(k2, (B, S, F), jnp.float32, -0.2, 1.2)

    out = jax.block_until_ready(gloss2(d_logits_real, d_logits_gen))
    ref = _gloss2_ref(d_logits_real, d_logits_gen)
    assert jnp.allclose(out, ref, rtol=1e-5, atol=1e-5), (out, ref)

    # Larger ragged shape: exercises the partial-tile mask and the 2-way
    # cross-core partition path (no padding copy: numel % 1024 == 0).
    B2, S2, F2 = 2, 1200, 64
    dr2 = jax.random.uniform(k3, (B2, S2, F2), jnp.float32, -0.2, 1.2)
    dg2 = jax.random.uniform(k4, (B2, S2, F2), jnp.float32, -0.2, 1.2)
    out2 = jax.block_until_ready(gloss2(dr2, dg2))
    ref2 = _gloss2_ref(dr2, dg2)
    assert jnp.allclose(out2, ref2, rtol=1e-4, atol=1e-2), (out2, ref2)

    # Smaller row tile: exercises the phantom-tile (clamped index_map) path.
    out3 = jax.block_until_ready(gloss2(dr2, dg2, row_tile=512))
    assert jnp.allclose(out3, ref2, rtol=1e-4, atol=1e-2), (out3, ref2)

    print("KERNEL_OK")
</pallas_src>

<mosaic_0001>
module attributes {stable_mosaic.version = 11 : i64} {
  func.func @_gloss2_kernel(%arg0: i32, %arg1: i32, %arg2: memref<8x128xf32, #tpu.memory_space<vmem>>, %arg3: memref<8x128xf32, #tpu.memory_space<vmem>>, %arg4: memref<8x128xf32, #tpu.memory_space<vmem>>, %arg5: memref<8x128xf32, #tpu.memory_space<vmem>>) attributes {dimension_semantics = [#tpu.dimension_semantics<parallel>, #tpu.dimension_semantics<arbitrary>], iteration_bounds = array<i64: 1, 1>, scalar_prefetch = 0 : i64, scratch_operands = 1 : i64, tpu.core_type = #tpu.core_type<tc>, window_params = [{transform_indices = @transform_0, window_bounds = array<i64: 8, 128>}, {transform_indices = @transform_1, window_bounds = array<i64: 8, 128>}, {transform_indices = @transform_2, window_bounds = array<i64: 8, 128>}]} {
    %c0_i32 = arith.constant 0 : i32
    %0 = arith.cmpi eq, %arg1, %c0_i32 : i32
    %1 = arith.extui %0 : i1 to i32
    %c0_i32_0 = arith.constant 0 : i32
    %2 = arith.cmpi ne, %1, %c0_i32_0 : i32
    scf.if %2 {
      %cst_13 = arith.constant 0.000000e+00 : f32
      %21 = vector.broadcast %cst_13 : f32 to vector<8x128xf32>
      %c0_14 = arith.constant 0 : index
      %c0_15 = arith.constant 0 : index
      %22 = vector.load %arg5[%c0_14, %c0_15] : memref<8x128xf32, #tpu.memory_space<vmem>>, vector<8x128xf32>
      tpu.vector_store %arg5[%c0_14, %c0_15], %21 {strides = array<i32>} : memref<8x128xf32, #tpu.memory_space<vmem>>, vector<8x128xf32>,
    } else {
    }
    %c0 = arith.constant 0 : index
    %c0_1 = arith.constant 0 : index
    %3 = vector.load %arg2[%c0, %c0_1] : memref<8x128xf32, #tpu.memory_space<vmem>>, vector<8x128xf32>
    %cst = arith.constant 9.999940e-41 : f32
    %cst_2 = arith.constant 1.000000e+00 : f32
    %4 = vector.broadcast %cst : f32 to vector<8x128xf32>
    %5 = arith.maximumf %4, %3 : vector<8x128xf32>
    %6 = vector.broadcast %cst_2 : f32 to vector<8x128xf32>
    %7 = arith.minimumf %6, %5 : vector<8x128xf32>
    %c0_3 = arith.constant 0 : index
    %c0_4 = arith.constant 0 : index
    %8 = vector.load %arg3[%c0_3, %c0_4] : memref<8x128xf32, #tpu.memory_space<vmem>>, vector<8x128xf32>
    %cst_5 = arith.constant 9.999940e-41 : f32
    %cst_6 = arith.constant 1.000000e+00 : f32
    %9 = vector.broadcast %cst_5 : f32 to vector<8x128xf32>
    %10 = arith.maximumf %9, %8 : vector<8x128xf32>
    %11 = vector.broadcast %cst_6 : f32 to vector<8x128xf32>
    %12 = arith.minimumf %11, %10 : vector<8x128xf32>
    %13 = arith.subf %7, %12 : vector<8x128xf32>
    %14 = arith.mulf %13, %13 : vector<8x128xf32>
    %c0_7 = arith.constant 0 : index
    %c0_8 = arith.constant 0 : index
    %15 = vector.load %arg5[%c0_7, %c0_8] : memref<8x128xf32, #tpu.memory_space<vmem>>, vector<8x128xf32>
    %16 = arith.addf %15, %14 : vector<8x128xf32>
    %c0_9 = arith.constant 0 : index
    %c0_10 = arith.constant 0 : index
    %17 = vector.load %arg5[%c0_9, %c0_10] : memref<8x128xf32, #tpu.memory_space<vmem>>, vector<8x128xf32>
    tpu.vector_store %arg5[%c0_9, %c0_10], %16 {strides = array<i32>} : memref<8x128xf32, #tpu.memory_space<vmem>>, vector<8x128xf32>,
    %c0_i32_11 = arith.constant 0 : i32
    %18 = arith.cmpi eq, %arg1, %c0_i32_11 : i32
    %19 = arith.extui %18 : i1 to i32
    %c0_i32_12 = arith.constant 0 : i32
    %20 = arith.cmpi ne, %19, %c0_i32_12 : i32
    scf.if %20 {
      %c0_13 = arith.constant 0 : index
      %c0_14 = arith.constant 0 : index
      %21 = vector.load %arg5[%c0_13, %c0_14] : memref<8x128xf32, #tpu.memory_space<vmem>>, vector<8x128xf32>
      %c0_15 = arith.constant 0 : index
      %c0_16 = arith.constant 0 : index
      %22 = vector.load %arg4[%c0_15, %c0_16] : memref<8x128xf32, #tpu.memory_space<vmem>>, vector<8x128xf32>
      tpu.vector_store %arg4[%c0_15, %c0_16], %21 {strides = array<i32>} : memref<8x128xf32, #tpu.memory_space<vmem>>, vector<8x128xf32>,
    } else {
    }
    return
  }
  func.func @transform_0(%arg0: i32, %arg1: i32) -> (i32, i32) {
    %c1_i32 = arith.constant 1 : i32
    %0 = arith.muli %arg0, %c1_i32 : i32
    %1 = arith.addi %0, %arg1 : i32
    %c0_i32 = arith.constant 0 : i32
    %c0_i32_0 = arith.constant 0 : i32
    return %1, %c0_i32 : i32, i32
  }
  func.func @transform_1(%arg0: i32, %arg1: i32) -> (i32, i32) {
    %c1_i32 = arith.constant 1 : i32
    %0 = arith.muli %arg0, %c1_i32 : i32
    %1 = arith.addi %0, %arg1 : i32
    %c0_i32 = arith.constant 0 : i32
    %c0_i32_0 = arith.constant 0 : i32
    return %1, %c0_i32 : i32, i32
  }
  func.func @transform_2(%arg0: i32, %arg1: i32) -> (i32, i32) {
    %c0_i32 = arith.constant 0 : i32
    %c0_i32_0 = arith.constant 0 : i32
    return %arg0, %c0_i32 : i32, i32
  }
}

</mosaic_0001>

<bundles_post_ra>
// kernel: tpu_custom_call.1
= control target key start
LH: loop header
LB: loop body
LE: loop exit
PB: predicated region body
PF: predicated region fallthrough
CT: control target
= control target key end

     0   :  { %7 = vsyncpa [#allocation4], 0  ;;  %s195_s0 = inlined_call_operand.hbm [shape: f32[8,128], index: 0, kind: input, shape index: {}]   ;;  %s196_s1 = inlined_call_operand.hbm [shape: f32[8,128], index: 1, kind: input, shape index: {}]   ;;  %s197_s2 = inlined_call_operand.hbm [shape: f32[8,128], index: 2, kind: output, shape index: {}]  }
   0x1   :  { %8 = vsyncpa [#allocation7], 0 }
   0x2   :  { %9 = vsyncpa [#allocation5], 0  ;;  %s18_s11 = sshll.u32 %s195_s0, 4  ;;  %s168_s12 = smov [#allocation3]   ;;  %s19_s11 = int_to_ptr.hbm [resolvable:$true] %s18_s11 }
   0x3   :  { %s20_s13 = sshll.u32 %s168_s12, 4  ;;  %s32_s16 = sshll.u32 %s196_s1, 4  ;;  %s21_s13 = int_to_ptr.vmem [resolvable:$true] %s20_s13  ;;  %s33_s16 = int_to_ptr.hbm [resolvable:$true] %s32_s16 }
   0x4   :  { %23 = dma.hbm_to_vmem [thread:$0]  %s19_s11, 128, %s21_s13, [#allocation4]  }
   0x5   :  { %s169_s17 = smov [#allocation6]  }
   0x6   :  { %s34_s18 = sshll.u32 %s169_s17, 4  ;;  %s35_s18 = int_to_ptr.vmem [resolvable:$true] %s34_s18 }
   0x7   :  { %37 = dma.hbm_to_vmem [thread:$0]  %s33_s16, 128, %s35_s18, [#allocation7]  }
   0x8   :  { %162 = dma.done.wait [#allocation4], 128  }
   0x9   :  { %163 = vsyncadd [#allocation4], 4294967168 }
   0xa   :  { %164 = dma.done.wait [#allocation7], 128  }
   0xb   :  { %165 = vsyncadd [#allocation7], 4294967168  ;;  %v53_v0 = vld [vmem:[#allocation3] sm:$0xff]  ;;  %v56_v1 = vld [vmem:[#allocation6] sm:$0xff]  ;;  %s170_s0 = smov [#allocation8]   ;;  %s76_s21 = sshll.u32 %s197_s2, 4  ;;  %s77_s21 = int_to_ptr.hbm [resolvable:$true] %s76_s21 }
   0xc   :  { %v54_v2 = vmax.f32 %v53_v0, 1e-40  ;;  %v57_v3 = vmax.f32 %v56_v1, 1e-40  ;;  %s74_s19 = sshll.u32 %s170_s0, 4  ;;  %s75_s19 = int_to_ptr.vmem [resolvable:$true] %s74_s19 }
   0xe   :  { %v55_v4 = vmin.f32 %v54_v2, 1.0  ;;  %v58_v5 = vmin.f32 %v57_v3, 1.0 }
  0x10   :  { %v59_v6 = vsub.f32 %v55_v4, %v58_v5 }
  0x12   :  { %v60_v7 = vmul.f32 %v59_v6, %v59_v6 }
  0x14   :  { %68 = vst [vmem:[#allocation8] sm:$0xff] %v60_v7 }
  0x15   :  { %79 = dma.vmem_to_hbm [thread:$0]  %s75_s19, 128, %s77_s21, [#allocation5]  }
  0x16   :  { %166 = dma.done.wait [#allocation5], 128  }
  0x17   :  { %167 = vsyncadd [#allocation5], 4294967168 }
  0x18   :  { %84 = vsyncpa [#allocation4], 1 }
  0x19   :  { %85 = vsyncpa [#allocation7], 1 }
  0x1a   :  { %86 = vsyncpa [#allocation5], 1 }

</bundles_post_ra>
